<compile_context>
chip_gen: v7x
topology: tpu7x:2x2x1
jax: 0.10.0
libtpu: 0.0.40
codegen_flags: <defaults>
</compile_context>

<pallas_src>
import functools

import jax
import jax.numpy as jnp
from jax.experimental import pallas as pl
from jax.experimental.pallas import tpu as pltpu

_LANES = 128                 # TPU vreg lane width
_MIN_GRID_STEPS = 4          # >= 2 steps per TensorCore on v7x; ~0.35us/step elsewhere


def _vmem_capacity_bytes():
    try:
        return int(pltpu.get_tpu_info().vmem_capacity_bytes)
    except Exception:
        return 64 * 1024 * 1024  # conservative (v7x-sized) default


def _pipeline_budget():
    """(vmem_limit_bytes, target_block_bytes) sized against the chip generation."""
    cap = _vmem_capacity_bytes()
    if cap >= 128 * 1024 * 1024:          # v5e / v6e: 128 MiB physical VMEM
        return 64 * 1024 * 1024, 8 * 1024 * 1024
    return 32 * 1024 * 1024, 4 * 1024 * 1024   # v7x: 64 MiB per TensorCore


def _sublane_quantum(itemsize):
    return 8 if itemsize >= 4 else (16 if itemsize == 2 else 32)


def _pick_block_rows(n_rows, n_lanes, itemsize, target_block_bytes):
    """Row blocks near the target size, sublane-aligned, >= _MIN_GRID_STEPS steps."""
    sub = _sublane_quantum(itemsize)
    if n_rows <= sub:
        return n_rows  # block dim == full array dim is always legal
    br = (target_block_bytes // (n_lanes * itemsize)) // sub * sub
    br = max(sub, br)
    cap = (n_rows // _MIN_GRID_STEPS) // sub * sub
    if cap >= sub:               # enough aligned blocks for >= 4 grid steps
        br = min(br, cap)
    return max(sub, min(br, n_rows))


def _ln_rowwise_kernel(x_ref, g_ref, b_ref, o_ref, *, inv_n, eps):
    """LayerNorm when each kernel row is exactly one logical row."""
    x = x_ref[...].astype(jnp.float32)
    mean = jnp.sum(x, axis=-1, keepdims=True) * inv_n
    d = x - mean
    var = jnp.sum(d * d, axis=-1, keepdims=True) * inv_n   # two-pass: no cancellation
    inv_std = jax.lax.rsqrt(var + eps)                      # EUP slot, effectively free
    scale = inv_std * g_ref[...]                            # fold gamma into inv_std
    o_ref[...] = (d * scale + b_ref[...]).astype(o_ref.dtype)


def _ln_grouped_kernel(x_ref, gmat_ref, g_ref, b_ref, o_ref, *, inv_n, eps):
    """LayerNorm with fold logical rows packed into one 128-lane kernel row.

    Group sums come from a block-diagonal ones matrix on the MXU, so every lane
    ends up with the sum over its own n_neurons-wide group (already broadcast
    across the group's lanes).  gmat carries the dot dtype (bf16 for 16-bit
    inputs to stay off v5e's slow f32 MXU path; f32 otherwise).
    """
    gm = gmat_ref[...]
    xd = x_ref[...]
    x = xd.astype(jnp.float32)
    s1 = jnp.dot(xd.astype(gm.dtype), gm, preferred_element_type=jnp.float32)
    mean = s1 * inv_n
    d = x - mean
    s2 = jnp.dot((d * d).astype(gm.dtype), gm, preferred_element_type=jnp.float32)
    var = s2 * inv_n
    inv_std = jax.lax.rsqrt(var + eps)
    scale = inv_std * g_ref[...]
    o_ref[...] = (d * scale + b_ref[...]).astype(o_ref.dtype)


def custom_layer_norm(x, gamma, beta, eps=1e-5):
    """Layer norm over the last axis of a 2-D input (n_batch, n_neurons)."""
    if x.ndim != 2:
        raise ValueError("expected input of shape (n_batch, n_neurons)")
    n_batch, n_neurons = x.shape
    if gamma.shape != (n_neurons,) or beta.shape != (n_neurons,):
        raise ValueError("gamma/beta must have shape (n_neurons,)")

    vmem_limit, target_block = _pipeline_budget()

    # Lane-dense folding: pack fold = 128 // n_neurons rows per 128-lane kernel row.
    fold = 1
    if n_neurons % _LANES != 0 and _LANES % n_neurons == 0:
        g = _LANES // n_neurons
        if n_batch % g == 0:
            fold = g
    # TODO(synk): for n_neurons neither a multiple nor a divisor of 128 the
    # fallback path emits masked partial stores on each row's tail vreg; lane
    # padding would trade extra wrapper HBM traffic for unmasked stores.

    lanes = n_neurons * fold
    rows = n_batch // fold
    x2 = x.reshape(rows, lanes)  # free, row-major-preserving reshape
    gamma_row = jnp.tile(gamma.astype(jnp.float32), fold).reshape(1, lanes)
    beta_row = jnp.tile(beta.astype(jnp.float32), fold).reshape(1, lanes)

    itemsize = x.dtype.itemsize
    block_rows = _pick_block_rows(rows, lanes, itemsize, target_block)
    grid = (pl.cdiv(rows, block_rows),)

    # Very wide feature dims: even the minimal sublane-aligned block may exceed
    # the target; grow the scoped-VMEM limit (within chip capacity) instead of
    # failing.  2x input + 2x output double buffers + small residents.
    # TODO(synk): for enormous n_neurons add a second "arbitrary" grid axis over
    # the feature dim with a two-pass/Welford accumulator instead of one giant block.
    block_bytes = block_rows * lanes * itemsize
    if 4 * block_bytes + (2 << 20) > vmem_limit:
        vmem_limit = min(4 * block_bytes + (2 << 20),
                         int(_vmem_capacity_bytes() * 0.9))

    x_spec = pl.BlockSpec((block_rows, lanes), lambda i: (i, 0))
    out_spec = pl.BlockSpec((block_rows, lanes), lambda i: (i, 0))
    vec_spec = pl.BlockSpec((1, lanes), lambda i: (0, 0))       # resident gamma/beta
    inv_n = 1.0 / float(n_neurons)

    if fold > 1:
        dot_dtype = x.dtype if itemsize == 2 else jnp.float32
        ids = jnp.arange(lanes, dtype=jnp.int32) // n_neurons
        gmat = (ids[:, None] == ids[None, :]).astype(dot_dtype)   # block-diagonal ones
        kernel = functools.partial(_ln_grouped_kernel, inv_n=inv_n, eps=float(eps))
        in_specs = [x_spec,
                    pl.BlockSpec((lanes, lanes), lambda i: (0, 0)),  # resident gmat
                    vec_spec, vec_spec]
        args = (x2, gmat, gamma_row, beta_row)
    else:
        kernel = functools.partial(_ln_rowwise_kernel, inv_n=inv_n, eps=float(eps))
        in_specs = [x_spec, vec_spec, vec_spec]
        args = (x2, gamma_row, beta_row)

    out2 = pl.pallas_call(
        kernel,
        out_shape=jax.ShapeDtypeStruct((rows, lanes), x.dtype),
        grid_spec=pltpu.PrefetchScalarGridSpec(
            num_scalar_prefetch=0,
            grid=grid,
            in_specs=in_specs,
            out_specs=out_spec,
        ),
        compiler_params=pltpu.CompilerParams(
            dimension_semantics=("parallel",),
            vmem_limit_bytes=int(vmem_limit),
        ),
    )(*args)
    return out2.reshape(n_batch, n_neurons)


if __name__ == "__main__":
    key = jax.random.PRNGKey(0)
    eps = 1e-5

    def reference(x, gamma, beta, eps):
        x = x.astype(jnp.float32)
        mean = jnp.mean(x, axis=1, keepdims=True)
        var = jnp.mean((x - mean) ** 2, axis=1, keepdims=True)
        return (x - mean) / jnp.sqrt(var + eps) * gamma + beta

    # Case 1: module-sized demo (n_batch=8, n_neurons=32) with __init__ params.
    n_batch, n_neurons = 8, 32
    k0, k1, k2 = jax.random.split(key, 3)
    x = jax.random.normal(k0, (n_batch, n_neurons), dtype=jnp.float32)
    gamma = jnp.ones((n_neurons,), dtype=jnp.float32)    # nn.Parameter init
    beta = jnp.zeros((n_neurons,), dtype=jnp.float32)
    out = jax.block_until_ready(custom_layer_norm(x, gamma, beta, eps=eps))
    assert out.shape == x.shape and out.dtype == x.dtype
    assert jnp.allclose(out, reference(x, gamma, beta, eps), atol=1e-5, rtol=1e-5)

    # Case 2: same shapes, non-trivial gamma/beta (validates lane-folded scale/shift).
    gamma2 = jax.random.normal(k1, (n_neurons,), dtype=jnp.float32)
    beta2 = jax.random.normal(k2, (n_neurons,), dtype=jnp.float32)
    out2 = jax.block_until_ready(custom_layer_norm(x, gamma2, beta2, eps=eps))
    assert jnp.allclose(out2, reference(x, gamma2, beta2, eps), atol=1e-5, rtol=1e-5)

    # Case 3: lane-dense feature dim (multiple of 128) with a multi-step grid.
    xb = jax.random.normal(k1, (64, 256), dtype=jnp.float32)
    gb = jax.random.normal(k2, (256,), dtype=jnp.float32)
    bb = jax.random.normal(k0, (256,), dtype=jnp.float32)
    outb = jax.block_until_ready(custom_layer_norm(xb, gb, bb, eps=eps))
    assert jnp.allclose(outb, reference(xb, gb, bb, eps), atol=1e-5, rtol=1e-5)

    # Case 4: bf16 input exercises the 16-bit (bf16-MXU) grouped group-sum path.
    xh = jax.random.normal(k2, (n_batch, n_neurons), dtype=jnp.float32).astype(jnp.bfloat16)
    outh = jax.block_until_ready(custom_layer_norm(xh, gamma2, beta2, eps=eps))
    refh = reference(xh.astype(jnp.float32), gamma2, beta2, eps)
    assert outh.dtype == jnp.bfloat16
    assert jnp.allclose(outh.astype(jnp.float32), refh, atol=6e-2, rtol=6e-2)

    print("KERNEL_OK")
</pallas_src>

<mosaic_0001>
module attributes {stable_mosaic.version = 11 : i64} {
  func.func @_ln_grouped_kernel(%arg0: i32, %arg1: memref<2x128xf32, #tpu.memory_space<vmem>>, %arg2: memref<128x128xf32, #tpu.memory_space<vmem>>, %arg3: memref<1x128xf32, #tpu.memory_space<vmem>>, %arg4: memref<1x128xf32, #tpu.memory_space<vmem>>, %arg5: memref<2x128xf32, #tpu.memory_space<vmem>>) attributes {dimension_semantics = [#tpu.dimension_semantics<parallel>], iteration_bounds = array<i64: 1>, scalar_prefetch = 0 : i64, scratch_operands = 0 : i64, tpu.core_type = #tpu.core_type<tc>, window_params = [{transform_indices = @transform_0, window_bounds = array<i64: 2, 128>}, {pipeline_mode = #tpu.pipeline_mode<synchronous>, transform_indices = @transform_1, window_bounds = array<i64: 128, 128>}, {pipeline_mode = #tpu.pipeline_mode<synchronous>, transform_indices = @transform_2, window_bounds = array<i64: 1, 128>}, {pipeline_mode = #tpu.pipeline_mode<synchronous>, transform_indices = @transform_3, window_bounds = array<i64: 1, 128>}, {transform_indices = @transform_4, window_bounds = array<i64: 2, 128>}]} {
    %c0 = arith.constant 0 : index
    %c0_0 = arith.constant 0 : index
    %0 = vector.load %arg2[%c0, %c0_0] : memref<128x128xf32, #tpu.memory_space<vmem>>, vector<128x128xf32>
    %c0_1 = arith.constant 0 : index
    %c0_2 = arith.constant 0 : index
    %1 = vector.load %arg1[%c0_1, %c0_2] : memref<2x128xf32, #tpu.memory_space<vmem>>, vector<2x128xf32>
    %cst = arith.constant dense<0.000000e+00> : vector<2x128xf32>
    %2 = tpu.matmul %1, %0, %cst {dimension_numbers = #tpu.dot_dimension_numbers<[1], [0], [0], [1], [0, 0, 1, 1], [], []>} : vector<2x128xf32>, vector<128x128xf32>, vector<2x128xf32> -> vector<2x128xf32>
    %cst_3 = arith.constant 3.125000e-02 : f32
    %3 = vector.broadcast %cst_3 : f32 to vector<2x128xf32>
    %4 = arith.mulf %2, %3 : vector<2x128xf32>
    %5 = arith.subf %1, %4 : vector<2x128xf32>
    %6 = arith.mulf %5, %5 : vector<2x128xf32>
    %cst_4 = arith.constant dense<0.000000e+00> : vector<2x128xf32>
    %7 = tpu.matmul %6, %0, %cst_4 {dimension_numbers = #tpu.dot_dimension_numbers<[1], [0], [0], [1], [0, 0, 1, 1], [], []>} : vector<2x128xf32>, vector<128x128xf32>, vector<2x128xf32> -> vector<2x128xf32>
    %cst_5 = arith.constant 3.125000e-02 : f32
    %8 = vector.broadcast %cst_5 : f32 to vector<2x128xf32>
    %9 = arith.mulf %7, %8 : vector<2x128xf32>
    %cst_6 = arith.constant 9.99999974E-6 : f32
    %10 = vector.broadcast %cst_6 : f32 to vector<2x128xf32>
    %11 = arith.addf %9, %10 : vector<2x128xf32>
    %12 = math.rsqrt %11 : vector<2x128xf32>
    %c0_7 = arith.constant 0 : index
    %c0_8 = arith.constant 0 : index
    %13 = vector.load %arg3[%c0_7, %c0_8] : memref<1x128xf32, #tpu.memory_space<vmem>>, vector<1x128xf32>
    %14 = vector.broadcast %13 : vector<1x128xf32> to vector<2x128xf32>
    %15 = arith.mulf %12, %14 : vector<2x128xf32>
    %16 = arith.mulf %5, %15 : vector<2x128xf32>
    %c0_9 = arith.constant 0 : index
    %c0_10 = arith.constant 0 : index
    %17 = vector.load %arg4[%c0_9, %c0_10] : memref<1x128xf32, #tpu.memory_space<vmem>>, vector<1x128xf32>
    %18 = vector.broadcast %17 : vector<1x128xf32> to vector<2x128xf32>
    %19 = arith.addf %16, %18 : vector<2x128xf32>
    %c0_11 = arith.constant 0 : index
    %c0_12 = arith.constant 0 : index
    %20 = vector.load %arg5[%c0_11, %c0_12] : memref<2x128xf32, #tpu.memory_space<vmem>>, vector<2x128xf32>
    tpu.vector_store %arg5[%c0_11, %c0_12], %19 {strides = array<i32>} : memref<2x128xf32, #tpu.memory_space<vmem>>, vector<2x128xf32>,
    return
  }
  func.func @transform_0(%arg0: i32) -> (i32, i32) {
    %c0_i32 = arith.constant 0 : i32
    %c0_i32_0 = arith.constant 0 : i32
    return %arg0, %c0_i32 : i32, i32
  }
  func.func @transform_1(%arg0: i32) -> (i32, i32) {
    %c0_i32 = arith.constant 0 : i32
    %c0_i32_0 = arith.constant 0 : i32
    %c0_i32_1 = arith.constant 0 : i32
    return %c0_i32, %c0_i32_0 : i32, i32
  }
  func.func @transform_2(%arg0: i32) -> (i32, i32) {
    %c0_i32 = arith.constant 0 : i32
    %c0_i32_0 = arith.constant 0 : i32
    %c0_i32_1 = arith.constant 0 : i32
    return %c0_i32, %c0_i32_0 : i32, i32
  }
  func.func @transform_3(%arg0: i32) -> (i32, i32) {
    %c0_i32 = arith.constant 0 : i32
    %c0_i32_0 = arith.constant 0 : i32
    %c0_i32_1 = arith.constant 0 : i32
    return %c0_i32, %c0_i32_0 : i32, i32
  }
  func.func @transform_4(%arg0: i32) -> (i32, i32) {
    %c0_i32 = arith.constant 0 : i32
    %c0_i32_0 = arith.constant 0 : i32
    return %arg0, %c0_i32 : i32, i32
  }
}

</mosaic_0001>

<bundles_post_ra>
// kernel: tpu_custom_call.1
= control target key start
LH: loop header
LB: loop body
LE: loop exit
PB: predicated region body
PF: predicated region fallthrough
CT: control target
= control target key end

     0   :  { %9 = vsyncpa [#allocation3], 0  ;;  %s559_s0 = inlined_call_operand.hbm [shape: f32[2,128], index: 0, kind: input, shape index: {}]   ;;  %s560_s1 = inlined_call_operand.hbm [shape: f32[128,128], index: 1, kind: input, shape index: {}]   ;;  %s561_s2 = inlined_call_operand.vmem [shape: f32[1,128], index: 2, kind: input, shape index: {}]   ;;  %s562_s3 = inlined_call_operand.vmem [shape: f32[1,128], index: 3, kind: input, shape index: {}]   ;;  %s563_s4 = inlined_call_operand.hbm [shape: f32[2,128], index: 4, kind: output, shape index: {}]  }
   0x1   :  { %10 = vsyncpa [#allocation6], 0 }
   0x2   :  { %11 = vsyncpa [#allocation4], 0  ;;  %s477_s15 = smov [#allocation2]   ;;  %s478_s17 = smov [#allocation5]  }
   0x3   :  { %s18_s16 = sshll.u32 %s477_s15, 4  ;;  %s27_s18 = sshll.u32 %s478_s17, 4  ;;  %s19_s16 = int_to_ptr.vmem [resolvable:$true] %s18_s16  ;;  %s510_s18 = int_to_ptr.vmem [resolvable:$true] %s27_s18 }
   0x4   :  { %s405_s21 = scalar_lea.hbm %s559_s0, 32 }
   0x5   :  { %p406_p0 = scmp.ne.s32.totalorder %s559_s0, %s405_s21  ;;  %p409_p1 = scmp.lt.u32.totalorder %s405_s21, %s559_s0 }
   0x7   :  { %p411_p2 = pnand %p409_p1, %p406_p0 }
   0x9   :  { %414 = shalt.err (!%p411_p2)
}
   0xa   :  { %s415_s26 = scalar_lea.vmem %s19_s16, 32  ;;  %p420_p4 = scmp.lt.s32.totalorder %s19_s16, %s19_s16 }
   0xb   :  { %p416_p3 = scmp.ne.s32.totalorder %s19_s16, %s415_s26  ;;  %p421_p5 = scmp.lt.s32.totalorder %s415_s26, %s415_s26 }
   0xd   :  { %p422_p6 = por %p421_p5, %p420_p4 }
   0xf   :  { %p423_p7 = pnand %p422_p6, %p416_p3 }
  0x11   :  { %426 = shalt.err (!%p423_p7)
}
  0x12   :  { %21 = dma.hbm_to_vmem [thread:$0]  %s559_s0, 32, %s19_s16, [#allocation3]  }
  0x13   :  { %s427_s5 = scalar_lea.hbm %s560_s1, 2048 }
  0x14   :  { %p428_p8 = scmp.ne.s32.totalorder %s560_s1, %s427_s5  ;;  %p431_p9 = scmp.lt.u32.totalorder %s427_s5, %s560_s1 }
  0x16   :  { %p433_p10 = pnand %p431_p9, %p428_p8 }
  0x18   :  { %436 = shalt.err (!%p433_p10)
}
  0x19   :  { %s437_s10 = scalar_lea.vmem %s510_s18, 2048  ;;  %p442_p12 = scmp.lt.s32.totalorder %s510_s18, %s510_s18 }
  0x1a   :  { %p438_p11 = scmp.ne.s32.totalorder %s510_s18, %s437_s10  ;;  %p443_p13 = scmp.lt.s32.totalorder %s437_s10, %s437_s10 }
  0x1c   :  { %p444_p0 = por %p443_p13, %p442_p12 }
  0x1e   :  { %p445_p1 = pnand %p444_p0, %p438_p11 }
  0x20   :  { %448 = shalt.err (!%p445_p1)
}
  0x21   :  { %s479_s0 = smov 128   ;;  %s480_s11 = smov 8  }
  0x22   :  { %33 = dma.hbm_to_vmem [thread:$0]  %s560_s1, 2048, %s510_s18, [#allocation6], %s479_s0, %s479_s0, %s480_s11  }
  0x23   :  { %471 = dma.done.wait [#allocation3], 32  }
  0x24   :  { %472 = vsyncadd [#allocation3], 4294967264 }
  0x25   :  { %473 = dma.done.wait [#allocation6], 2048  }
  0x26   :  { %474 = vsyncadd [#allocation6], 4294965248  ;;  %v481_v0 = vmov 0.0|0.0   ;;  %vm482_vm0 = vmmov 0   ;;  %v483_v1 = vmov 0.0   ;;  %v44_v2 = vld [vmem:[#allocation5] sm:$0xff] }
  0x27   :  { %347 = vmatprep.subr.bf16.mxu0 %v481_v0  ;;  %309 = vmatprep.mubr.msk.f32.mxu0 %vm482_vm0, %v483_v1  ;;  %v45_v3 = vld [vmem:[#allocation5 + $0x8] sm:$0xff]  ;;  %v46_v4 = vld [vmem:[#allocation5 + $0x10] sm:$0xff]  ;;  %v47_v6 = vld [vmem:[#allocation5 + $0x18] sm:$0xff]  ;;  %s484_s17 = smov [#allocation7]  }
  0x28   :  { %371 = vmatprep.subr.bf16.mxu1 %v481_v0  ;;  %344 = vmatprep.mubr.msk.f32.mxu1 %vm482_vm0, %v483_v1  ;;  %v348_v5 = vpack.c.bf16 %v45_v3, %v44_v2  ;;  %v351_v7 = vpack.c.bf16 %v47_v6, %v46_v4  ;;  %v48_v8 = vld [vmem:[#allocation5 + $0x20] sm:$0xff]  ;;  %v49_v9 = vld [vmem:[#allocation5 + $0x28] sm:$0xff]  ;;  %v50_v11 = vld [vmem:[#allocation5 + $0x30] sm:$0xff]  ;;  %s231_s18 = sshll.u32 %s484_s17, 4  ;;  %s232_s18 = int_to_ptr.vmem [resolvable:$true] %s231_s18 }
  0x29   :  { %v354_v10 = vpack.c.bf16 %v49_v9, %v48_v8  ;;  %v51_v12 = vld [vmem:[#allocation5 + $0x38] sm:$0xff]  ;;  %v52_v14 = vld [vmem:[#allocation5 + $0x40] sm:$0xff]  ;;  %v53_v15 = vld [vmem:[#allocation5 + $0x48] sm:$0xff]  ;;  %s449_s19 = scalar_lea.vmem %s232_s18, 32  ;;  %p454_p3 = scmp.lt.s32.totalorder %s232_s18, %s232_s18 }
  0x2a   :  { %349 = vmatpush3.bf16.msra.mxu0 %v348_v5  ;;  %373 = vmatpush3.bf16.msra.mxu1 %v348_v5  ;;  %v357_v13 = vpack.c.bf16 %v51_v12, %v50_v11  ;;  %v360_v16 = vpack.c.bf16 %v53_v15, %v52_v14  ;;  %v54_v17 = vld [vmem:[#allocation5 + $0x50] sm:$0xff]  ;;  %v55_v18 = vld [vmem:[#allocation5 + $0x58] sm:$0xff]  ;;  %v56_v20 = vld [vmem:[#allocation5 + $0x60] sm:$0xff]  ;;  %p450_p2 = scmp.ne.s32.totalorder %s232_s18, %s449_s19  ;;  %p455_p4 = scmp.lt.s32.totalorder %s449_s19, %s449_s19 }
  0x2b   :  { %350 = vmatprep.subr.bf16.mxu0 %v481_v0  ;;  %374 = vmatprep.subr.bf16.mxu1 %v481_v0  ;;  %v363_v19 = vpack.c.bf16 %v55_v18, %v54_v17  ;;  %v57_v21 = vld [vmem:[#allocation5 + $0x68] sm:$0xff]  ;;  %v58_v23 = vld [vmem:[#allocation5 + $0x70] sm:$0xff]  ;;  %v59_v24 = vld [vmem:[#allocation5 + $0x78] sm:$0xff] }
  0x2c   :  { %v366_v22 = vpack.c.bf16 %v57_v21, %v56_v20  ;;  %v369_v25 = vpack.c.bf16 %v59_v24, %v58_v23  ;;  %v60_v26 = vld [vmem:[#allocation2] sm:$0x3]  ;;  %p456_p5 = por %p455_p4, %p454_p3 }
  0x2d   :  { %v241_v36 = vld [vmem:[%s561_s2] ss:$0 sm:$0xff] }
  0x2e   :  { %352 = vmatpush3.bf16.msra.mxu0 %v351_v7  ;;  %376 = vmatpush3.bf16.msra.mxu1 %v351_v7  ;;  %v242_v39 = vld [vmem:[%s562_s3] ss:$0 sm:$0xff]  ;;  %p457_p6 = pnand %p456_p5, %p450_p2 }
  0x2f   :  { %353 = vmatprep.subr.bf16.mxu0 %v481_v0  ;;  %377 = vmatprep.subr.bf16.mxu1 %v481_v0 }
  0x32   :  { %355 = vmatpush3.bf16.msra.mxu0 %v354_v10  ;;  %379 = vmatpush3.bf16.msra.mxu1 %v354_v10 }
  0x33   :  { %356 = vmatprep.subr.bf16.mxu0 %v481_v0  ;;  %380 = vmatprep.subr.bf16.mxu1 %v481_v0 }
  0x36   :  { %358 = vmatpush3.bf16.msra.mxu0 %v357_v13  ;;  %382 = vmatpush3.bf16.msra.mxu1 %v357_v13 }
  0x37   :  { %359 = vmatprep.subr.bf16.mxu0 %v481_v0  ;;  %383 = vmatprep.subr.bf16.mxu1 %v481_v0 }
  0x3a   :  { %361 = vmatpush3.bf16.msra.mxu0 %v360_v16  ;;  %385 = vmatpush3.bf16.msra.mxu1 %v360_v16 }
  0x3b   :  { %362 = vmatprep.subr.bf16.mxu0 %v481_v0  ;;  %386 = vmatprep.subr.bf16.mxu1 %v481_v0 }
  0x3e   :  { %364 = vmatpush3.bf16.msra.mxu0 %v363_v19  ;;  %388 = vmatpush3.bf16.msra.mxu1 %v363_v19 }
  0x3f   :  { %365 = vmatprep.subr.bf16.mxu0 %v481_v0  ;;  %389 = vmatprep.subr.bf16.mxu1 %v481_v0 }
  0x42   :  { %367 = vmatpush3.bf16.msra.mxu0 %v366_v22  ;;  %391 = vmatpush3.bf16.msra.mxu1 %v366_v22 }
  0x43   :  { %368 = vmatprep.subr.bf16.mxu0 %v481_v0  ;;  %392 = vmatprep.subr.bf16.mxu1 %v481_v0 }
  0x46   :  { %370 = vmatpush3.bf16.msra.mxu0 %v369_v25  ;;  %394 = vmatpush3.bf16.msra.mxu1 %v369_v25 }
  0x49   :  { %310 = vmatmul.mubr.f32.vlgmr.msra.gmra.mrb[0].mxu0 %v60_v26 }
 0x11c   :  { %v127_v27 = vpop.f32.mrb[0].mxu0 }
 0x11d   :  { %v131_v28 = vmul.f32 0.03125, %v127_v27  ;;  %v311_v29 = vpop.f32.mrb[1].mxu0 }
 0x11f   :  { %v132_v30 = vsub.f32 %v60_v26, %v131_v28 }
 0x121   :  { %v133_v31 = vmul.f32 %v132_v30, %v132_v30 }
 0x123   :  { %345 = vmatmul.mubr.f32.vlgmr.msra.gmra.mrb[0].mxu1 %v133_v31 }
 0x1f6   :  { %v200_v32 = vpop.f32.mrb[0].mxu1 }
 0x1f7   :  { %v204_v33 = vmul.f32 0.03125, %v200_v32  ;;  %v346_v34 = vpop.f32.mrb[1].mxu1 }
 0x1f9   :  { %v205_v35 = vadd.f32 1e-05, %v204_v33 }
 0x1fb   :  { %403 = vrsqrt.f32 %v205_v35 }
 0x205   :  { %v404_v37 = vpop.eup %403 }
 0x206   :  { %v214_v38 = vmul.f32 %v404_v37, %v241_v36 }
 0x208   :  { %v215_v40 = vmul.f32 %v214_v38, %v132_v30 }
 0x20a   :  { %v223_v41 = vadd.f32 %v242_v39, %v215_v40 }
 0x20c   :  { %224 = vst [vmem:[#allocation7] sm:$0x3] %v223_v41 }
 0x20d   :  { %460 = shalt.err (!%p457_p6)
}
 0x20e   :  { %s461_s21 = scalar_lea.hbm %s563_s4, 32 }
 0x20f   :  { %p462_p7 = scmp.ne.s32.totalorder %s563_s4, %s461_s21  ;;  %p465_p8 = scmp.lt.u32.totalorder %s461_s21, %s563_s4 }
 0x211   :  { %p467_p9 = pnand %p465_p8, %p462_p7 }
 0x213   :  { %470 = shalt.err (!%p467_p9)
}
 0x214   :  { %234 = dma.vmem_to_hbm [thread:$0]  %s232_s18, 32, %s563_s4, [#allocation4]  }
 0x215   :  { %475 = dma.done.wait [#allocation4], 32  }
 0x216   :  { %476 = vsyncadd [#allocation4], 4294967264 }
 0x217   :  { %238 = vsyncpa [#allocation3], 1 }
 0x218   :  { %239 = vsyncpa [#allocation6], 1 }
 0x219   :  { %240 = vsyncpa [#allocation4], 1 }

</bundles_post_ra>
